<compile_context>
chip_gen: v7x
topology: tpu7x:2x2x1
jax: 0.10.0
libtpu: 0.0.40
codegen_flags: <defaults>
</compile_context>

<pallas_src>
import jax
import jax.numpy as jnp
from jax.experimental import pallas as pl
from jax.experimental.pallas import tpu as pltpu

LANE = 128


def _round_up(n, m):
    return (n + m - 1) // m * m


def climanet_kernel(x_ref,
                    w1_ref, b1_ref,
                    w2_ref, b2_ref,
                    w3_ref, b3_ref,
                    w4_ref, b4_ref,
                    w5_ref, b5_ref,
                    out_ref):
    """Fused 5-layer MLP: 4x (Linear + ReLU) followed by a final Linear.

    Weights arrive as bf16 (in, out) tiles padded to 128 lanes; biases are f32
    (1, out_pad). Matmuls use the bf16 MXU path with f32 accumulation; the
    bias-add / ReLU epilogues stay in f32.
    """

    def layer(h_bf16, w_ref, b_ref, relu):
        acc = jnp.dot(h_bf16, w_ref[...], preferred_element_type=jnp.float32)
        acc = acc + b_ref[...]
        if relu:
            acc = jnp.maximum(acc, 0.0)
        return acc

    h = x_ref[...].astype(jnp.bfloat16)
    h = layer(h, w1_ref, b1_ref, True).astype(jnp.bfloat16)
    h = layer(h, w2_ref, b2_ref, True).astype(jnp.bfloat16)
    h = layer(h, w3_ref, b3_ref, True).astype(jnp.bfloat16)
    h = layer(h, w4_ref, b4_ref, True).astype(jnp.bfloat16)
    out = layer(h, w5_ref, b5_ref, False)

    out_ref[...] = out.astype(out_ref.dtype)


def prepare_params(params):
    """Pad hidden feature widths to 128 lanes and cast weights to bf16.

    Input: 'w{i}' of shape (in, out) f32 and 'b{i}' of shape (1, out) f32.
    Returns the flat kernel argument list [w1, b1, ..., w5, b5] where every
    intermediate feature width is padded to a multiple of 128 with zeros
    (ReLU(0 + 0) = 0, and the matching zero weight rows contribute nothing,
    so results are unchanged). The final layer's output width is unpadded.
    """
    prepared = []
    prev_pad = params["w1"].shape[0]  # input feature dim stays unpadded
    n_layers = 5
    for i in range(1, n_layers + 1):
        w = params[f"w{i}"]
        b = params[f"b{i}"]
        fan_in, fan_out = w.shape
        out_pad = fan_out if i == n_layers else _round_up(fan_out, LANE)
        w_p = jnp.zeros((prev_pad, out_pad), jnp.float32)
        w_p = w_p.at[:fan_in, :fan_out].set(w)
        b_p = jnp.zeros((1, out_pad), jnp.float32).at[:, :fan_out].set(b)
        prepared.append(w_p.astype(jnp.bfloat16))  # bf16 MXU operand
        prepared.append(b_p)                       # bias stays f32
        prev_pad = out_pad
    return prepared


def climanet_forward(x, prepared_params, *, max_block_batch=1024):
    """Run ClimaNet forward via pallas_call.

    Args:
      x: (B, input_size) float32 activations.
      prepared_params: output of prepare_params (padded bf16 weights / f32 biases).
    Returns:
      (B, output_size) float32.
    """
    B, in_size = x.shape
    out_size = prepared_params[-2].shape[1]

    # Batch tile: large enough to amortize per-grid-step overhead, capped so
    # large batches still produce multiple grid steps, multiple of 8 sublanes.
    block = min(_round_up(B, 8), max_block_batch)
    padded_B = _round_up(B, block)
    if padded_B != B:
        x = jnp.pad(x, ((0, padded_B - B), (0, 0)))

    # Weights/biases are tiny (<100 KiB total): keep them as untiled, resident
    # VMEM operands instead of grid-blocked/double-buffered streams.
    resident = pl.BlockSpec(memory_space=pltpu.MemorySpace.VMEM)
    in_specs = [pl.BlockSpec((block, in_size), lambda i: (i, 0))]
    in_specs += [resident] * len(prepared_params)

    out = pl.pallas_call(
        climanet_kernel,
        out_shape=jax.ShapeDtypeStruct((padded_B, out_size), jnp.float32),
        grid=(padded_B // block,),
        in_specs=in_specs,
        out_specs=pl.BlockSpec((block, out_size), lambda i: (i, 0)),
        compiler_params=pltpu.CompilerParams(
            dimension_semantics=("parallel",)),
    )(x, *prepared_params)

    return out[:B]


def init_params(key, input_size, hidden, hidden2, hidden3, output_size):
    """Deterministic param init mimicking nn.Linear's U(-1/sqrt(in), 1/sqrt(in))."""
    dims = [(input_size, hidden), (hidden, hidden2), (hidden2, hidden3),
            (hidden3, hidden3), (hidden3, output_size)]
    params = {}
    keys = jax.random.split(key, 2 * len(dims))
    for idx, (fan_in, fan_out) in enumerate(dims):
        bound = 1.0 / (fan_in ** 0.5)
        # Stored directly as (in, out)  ==  PyTorch weight (out, in) transposed.
        params[f"w{idx + 1}"] = jax.random.uniform(
            keys[2 * idx], (fan_in, fan_out), jnp.float32, -bound, bound)
        params[f"b{idx + 1}"] = jax.random.uniform(
            keys[2 * idx + 1], (1, fan_out), jnp.float32, -bound, bound)
    return params


def climanet_reference(x, params):
    """Pure-JAX reference with matching bf16-operand / f32-accumulate numerics."""
    h = x
    for i in range(1, 5):
        h = jnp.maximum(
            jnp.dot(h.astype(jnp.bfloat16),
                    params[f"w{i}"].astype(jnp.bfloat16),
                    preferred_element_type=jnp.float32) + params[f"b{i}"], 0.0)
    return jnp.dot(h.astype(jnp.bfloat16),
                   params["w5"].astype(jnp.bfloat16),
                   preferred_element_type=jnp.float32) + params["b5"]


if __name__ == "__main__":
    # Small shapes consistent with the module's forward.
    batch = 16
    input_size, hidden, hidden2, hidden3, output_size = 32, 64, 48, 32, 8

    key = jax.random.PRNGKey(0)
    pkey, xkey = jax.random.split(key)
    params = init_params(pkey, input_size, hidden, hidden2, hidden3,
                         output_size)
    x = jax.random.normal(xkey, (batch, input_size), jnp.float32)

    prepared = prepare_params(params)
    out = climanet_forward(x, prepared)
    out = jax.block_until_ready(out)

    ref = climanet_reference(x, params)
    assert out.shape == (batch, output_size)
    assert jnp.allclose(out, ref, atol=2e-3, rtol=2e-3), "mismatch vs reference"

    print("KERNEL_OK")
</pallas_src>

<mosaic_0001>
module attributes {stable_mosaic.version = 11 : i64} {
  func.func @climanet_kernel(%arg0: i32, %arg1: memref<16x32xf32, #tpu.memory_space<vmem>>, %arg2: memref<32x128xbf16, #tpu.memory_space<vmem>>, %arg3: memref<1x128xf32, #tpu.memory_space<vmem>>, %arg4: memref<128x128xbf16, #tpu.memory_space<vmem>>, %arg5: memref<1x128xf32, #tpu.memory_space<vmem>>, %arg6: memref<128x128xbf16, #tpu.memory_space<vmem>>, %arg7: memref<1x128xf32, #tpu.memory_space<vmem>>, %arg8: memref<128x128xbf16, #tpu.memory_space<vmem>>, %arg9: memref<1x128xf32, #tpu.memory_space<vmem>>, %arg10: memref<128x8xbf16, #tpu.memory_space<vmem>>, %arg11: memref<1x8xf32, #tpu.memory_space<vmem>>, %arg12: memref<16x8xf32, #tpu.memory_space<vmem>>) attributes {dimension_semantics = [#tpu.dimension_semantics<parallel>], iteration_bounds = array<i64: 1>, scalar_prefetch = 0 : i64, scratch_operands = 0 : i64, tpu.core_type = #tpu.core_type<tc>, window_params = [{transform_indices = @transform_0, window_bounds = array<i64: 16, 32>}, {pipeline_mode = #tpu.pipeline_mode<synchronous>, transform_indices = @transform_1, window_bounds = array<i64: 32, 128>}, {pipeline_mode = #tpu.pipeline_mode<synchronous>, transform_indices = @transform_2, window_bounds = array<i64: 1, 128>}, {pipeline_mode = #tpu.pipeline_mode<synchronous>, transform_indices = @transform_3, window_bounds = array<i64: 128, 128>}, {pipeline_mode = #tpu.pipeline_mode<synchronous>, transform_indices = @transform_4, window_bounds = array<i64: 1, 128>}, {pipeline_mode = #tpu.pipeline_mode<synchronous>, transform_indices = @transform_5, window_bounds = array<i64: 128, 128>}, {pipeline_mode = #tpu.pipeline_mode<synchronous>, transform_indices = @transform_6, window_bounds = array<i64: 1, 128>}, {pipeline_mode = #tpu.pipeline_mode<synchronous>, transform_indices = @transform_7, window_bounds = array<i64: 128, 128>}, {pipeline_mode = #tpu.pipeline_mode<synchronous>, transform_indices = @transform_8, window_bounds = array<i64: 1, 128>}, {pipeline_mode = #tpu.pipeline_mode<synchronous>, transform_indices = @transform_9, window_bounds = array<i64: 128, 8>}, {pipeline_mode = #tpu.pipeline_mode<synchronous>, transform_indices = @transform_10, window_bounds = array<i64: 1, 8>}, {transform_indices = @transform_11, window_bounds = array<i64: 16, 8>}]} {
    %c0 = arith.constant 0 : index
    %c0_0 = arith.constant 0 : index
    %0 = vector.load %arg1[%c0, %c0_0] : memref<16x32xf32, #tpu.memory_space<vmem>>, vector<16x32xf32>
    %1 = arith.truncf %0 : vector<16x32xf32> to vector<16x32xbf16>
    %c0_1 = arith.constant 0 : index
    %c0_2 = arith.constant 0 : index
    %2 = vector.load %arg2[%c0_1, %c0_2] : memref<32x128xbf16, #tpu.memory_space<vmem>>, vector<32x128xbf16>
    %cst = arith.constant dense<0.000000e+00> : vector<16x128xf32>
    %3 = tpu.matmul %1, %2, %cst {dimension_numbers = #tpu.dot_dimension_numbers<[1], [0], [0], [1], [0, 0, 1, 1], [], []>} : vector<16x32xbf16>, vector<32x128xbf16>, vector<16x128xf32> -> vector<16x128xf32>
    %c0_3 = arith.constant 0 : index
    %c0_4 = arith.constant 0 : index
    %4 = vector.load %arg3[%c0_3, %c0_4] : memref<1x128xf32, #tpu.memory_space<vmem>>, vector<1x128xf32>
    %5 = vector.broadcast %4 : vector<1x128xf32> to vector<16x128xf32>
    %6 = arith.addf %3, %5 : vector<16x128xf32>
    %cst_5 = arith.constant 0.000000e+00 : f32
    %7 = vector.broadcast %cst_5 : f32 to vector<16x128xf32>
    %8 = arith.maximumf %6, %7 : vector<16x128xf32>
    %9 = arith.truncf %8 : vector<16x128xf32> to vector<16x128xbf16>
    %c0_6 = arith.constant 0 : index
    %c0_7 = arith.constant 0 : index
    %10 = vector.load %arg4[%c0_6, %c0_7] : memref<128x128xbf16, #tpu.memory_space<vmem>>, vector<128x128xbf16>
    %cst_8 = arith.constant dense<0.000000e+00> : vector<16x128xf32>
    %11 = tpu.matmul %9, %10, %cst_8 {dimension_numbers = #tpu.dot_dimension_numbers<[1], [0], [0], [1], [0, 0, 1, 1], [], []>} : vector<16x128xbf16>, vector<128x128xbf16>, vector<16x128xf32> -> vector<16x128xf32>
    %c0_9 = arith.constant 0 : index
    %c0_10 = arith.constant 0 : index
    %12 = vector.load %arg5[%c0_9, %c0_10] : memref<1x128xf32, #tpu.memory_space<vmem>>, vector<1x128xf32>
    %13 = vector.broadcast %12 : vector<1x128xf32> to vector<16x128xf32>
    %14 = arith.addf %11, %13 : vector<16x128xf32>
    %cst_11 = arith.constant 0.000000e+00 : f32
    %15 = vector.broadcast %cst_11 : f32 to vector<16x128xf32>
    %16 = arith.maximumf %14, %15 : vector<16x128xf32>
    %17 = arith.truncf %16 : vector<16x128xf32> to vector<16x128xbf16>
    %c0_12 = arith.constant 0 : index
    %c0_13 = arith.constant 0 : index
    %18 = vector.load %arg6[%c0_12, %c0_13] : memref<128x128xbf16, #tpu.memory_space<vmem>>, vector<128x128xbf16>
    %cst_14 = arith.constant dense<0.000000e+00> : vector<16x128xf32>
    %19 = tpu.matmul %17, %18, %cst_14 {dimension_numbers = #tpu.dot_dimension_numbers<[1], [0], [0], [1], [0, 0, 1, 1], [], []>} : vector<16x128xbf16>, vector<128x128xbf16>, vector<16x128xf32> -> vector<16x128xf32>
    %c0_15 = arith.constant 0 : index
    %c0_16 = arith.constant 0 : index
    %20 = vector.load %arg7[%c0_15, %c0_16] : memref<1x128xf32, #tpu.memory_space<vmem>>, vector<1x128xf32>
    %21 = vector.broadcast %20 : vector<1x128xf32> to vector<16x128xf32>
    %22 = arith.addf %19, %21 : vector<16x128xf32>
    %cst_17 = arith.constant 0.000000e+00 : f32
    %23 = vector.broadcast %cst_17 : f32 to vector<16x128xf32>
    %24 = arith.maximumf %22, %23 : vector<16x128xf32>
    %25 = arith.truncf %24 : vector<16x128xf32> to vector<16x128xbf16>
    %c0_18 = arith.constant 0 : index
    %c0_19 = arith.constant 0 : index
    %26 = vector.load %arg8[%c0_18, %c0_19] : memref<128x128xbf16, #tpu.memory_space<vmem>>, vector<128x128xbf16>
    %cst_20 = arith.constant dense<0.000000e+00> : vector<16x128xf32>
    %27 = tpu.matmul %25, %26, %cst_20 {dimension_numbers = #tpu.dot_dimension_numbers<[1], [0], [0], [1], [0, 0, 1, 1], [], []>} : vector<16x128xbf16>, vector<128x128xbf16>, vector<16x128xf32> -> vector<16x128xf32>
    %c0_21 = arith.constant 0 : index
    %c0_22 = arith.constant 0 : index
    %28 = vector.load %arg9[%c0_21, %c0_22] : memref<1x128xf32, #tpu.memory_space<vmem>>, vector<1x128xf32>
    %29 = vector.broadcast %28 : vector<1x128xf32> to vector<16x128xf32>
    %30 = arith.addf %27, %29 : vector<16x128xf32>
    %cst_23 = arith.constant 0.000000e+00 : f32
    %31 = vector.broadcast %cst_23 : f32 to vector<16x128xf32>
    %32 = arith.maximumf %30, %31 : vector<16x128xf32>
    %33 = arith.truncf %32 : vector<16x128xf32> to vector<16x128xbf16>
    %c0_24 = arith.constant 0 : index
    %c0_25 = arith.constant 0 : index
    %34 = vector.load %arg10[%c0_24, %c0_25] : memref<128x8xbf16, #tpu.memory_space<vmem>>, vector<128x8xbf16>
    %cst_26 = arith.constant dense<0.000000e+00> : vector<16x8xf32>
    %35 = tpu.matmul %33, %34, %cst_26 {dimension_numbers = #tpu.dot_dimension_numbers<[1], [0], [0], [1], [0, 0, 1, 1], [], []>} : vector<16x128xbf16>, vector<128x8xbf16>, vector<16x8xf32> -> vector<16x8xf32>
    %c0_27 = arith.constant 0 : index
    %c0_28 = arith.constant 0 : index
    %36 = vector.load %arg11[%c0_27, %c0_28] : memref<1x8xf32, #tpu.memory_space<vmem>>, vector<1x8xf32>
    %37 = vector.broadcast %36 : vector<1x8xf32> to vector<16x8xf32>
    %38 = arith.addf %35, %37 : vector<16x8xf32>
    %c0_29 = arith.constant 0 : index
    %c0_30 = arith.constant 0 : index
    %39 = vector.load %arg12[%c0_29, %c0_30] : memref<16x8xf32, #tpu.memory_space<vmem>>, vector<16x8xf32>
    tpu.vector_store %arg12[%c0_29, %c0_30], %38 {strides = array<i32>} : memref<16x8xf32, #tpu.memory_space<vmem>>, vector<16x8xf32>,
    return
  }
  func.func @transform_0(%arg0: i32) -> (i32, i32) {
    %c0_i32 = arith.constant 0 : i32
    %c0_i32_0 = arith.constant 0 : i32
    return %arg0, %c0_i32 : i32, i32
  }
  func.func @transform_1(%arg0: i32) -> (i32, i32) {
    %c0_i32 = arith.constant 0 : i32
    %c0_i32_0 = arith.constant 0 : i32
    %c0_i32_1 = arith.constant 0 : i32
    return %c0_i32, %c0_i32_0 : i32, i32
  }
  func.func @transform_2(%arg0: i32) -> (i32, i32) {
    %c0_i32 = arith.constant 0 : i32
    %c0_i32_0 = arith.constant 0 : i32
    %c0_i32_1 = arith.constant 0 : i32
    return %c0_i32, %c0_i32_0 : i32, i32
  }
  func.func @transform_3(%arg0: i32) -> (i32, i32) {
    %c0_i32 = arith.constant 0 : i32
    %c0_i32_0 = arith.constant 0 : i32
    %c0_i32_1 = arith.constant 0 : i32
    return %c0_i32, %c0_i32_0 : i32, i32
  }
  func.func @transform_4(%arg0: i32) -> (i32, i32) {
    %c0_i32 = arith.constant 0 : i32
    %c0_i32_0 = arith.constant 0 : i32
    %c0_i32_1 = arith.constant 0 : i32
    return %c0_i32, %c0_i32_0 : i32, i32
  }
  func.func @transform_5(%arg0: i32) -> (i32, i32) {
    %c0_i32 = arith.constant 0 : i32
    %c0_i32_0 = arith.constant 0 : i32
    %c0_i32_1 = arith.constant 0 : i32
    return %c0_i32, %c0_i32_0 : i32, i32
  }
  func.func @transform_6(%arg0: i32) -> (i32, i32) {
    %c0_i32 = arith.constant 0 : i32
    %c0_i32_0 = arith.constant 0 : i32
    %c0_i32_1 = arith.constant 0 : i32
    return %c0_i32, %c0_i32_0 : i32, i32
  }
  func.func @transform_7(%arg0: i32) -> (i32, i32) {
    %c0_i32 = arith.constant 0 : i32
    %c0_i32_0 = arith.constant 0 : i32
    %c0_i32_1 = arith.constant 0 : i32
    return %c0_i32, %c0_i32_0 : i32, i32
  }
  func.func @transform_8(%arg0: i32) -> (i32, i32) {
    %c0_i32 = arith.constant 0 : i32
    %c0_i32_0 = arith.constant 0 : i32
    %c0_i32_1 = arith.constant 0 : i32
    return %c0_i32, %c0_i32_0 : i32, i32
  }
  func.func @transform_9(%arg0: i32) -> (i32, i32) {
    %c0_i32 = arith.constant 0 : i32
    %c0_i32_0 = arith.constant 0 : i32
    %c0_i32_1 = arith.constant 0 : i32
    return %c0_i32, %c0_i32_0 : i32, i32
  }
  func.func @transform_10(%arg0: i32) -> (i32, i32) {
    %c0_i32 = arith.constant 0 : i32
    %c0_i32_0 = arith.constant 0 : i32
    %c0_i32_1 = arith.constant 0 : i32
    return %c0_i32, %c0_i32_0 : i32, i32
  }
  func.func @transform_11(%arg0: i32) -> (i32, i32) {
    %c0_i32 = arith.constant 0 : i32
    %c0_i32_0 = arith.constant 0 : i32
    return %arg0, %c0_i32 : i32, i32
  }
}

</mosaic_0001>

<bundles_post_ra>
// kernel: tpu_custom_call.1
= control target key start
LH: loop header
LB: loop body
LE: loop exit
PB: predicated region body
PF: predicated region fallthrough
CT: control target
= control target key end

     0   :  { %16 = vsyncpa [#allocation3], 0  ;;  %s1187_s0 = inlined_call_operand.hbm [shape: f32[16,32], index: 0, kind: input, shape index: {}]   ;;  %s1188_s1 = inlined_call_operand.hbm [shape: bf16[32,128], index: 1, kind: input, shape index: {}]   ;;  %s1189_s2 = inlined_call_operand.vmem [shape: f32[1,128], index: 2, kind: input, shape index: {}]   ;;  %s1190_s3 = inlined_call_operand.vmem [shape: bf16[128,128], index: 3, kind: input, shape index: {}]   ;;  %s1191_s4 = inlined_call_operand.vmem [shape: f32[1,128], index: 4, kind: input, shape index: {}]   ;;  %s1192_s5 = inlined_call_operand.hbm [shape: bf16[128,128], index: 5, kind: input, shape index: {}]   ;;  %s1193_s6 = inlined_call_operand.vmem [shape: f32[1,128], index: 6, kind: input, shape index: {}]   ;;  %s1194_s7 = inlined_call_operand.hbm [shape: bf16[128,128], index: 7, kind: input, shape index: {}]   ;;  %s1195_s8 = inlined_call_operand.vmem [shape: f32[1,128], index: 8, kind: input, shape index: {}]   ;;  %s1196_s9 = inlined_call_operand.vmem [shape: bf16[128,8], index: 9, kind: input, shape index: {}]   ;;  %s1197_s10 = inlined_call_operand.vmem [shape: f32[1,8], index: 10, kind: input, shape index: {}]   ;;  %s1198_s11 = inlined_call_operand.vmem [shape: f32[16,8], index: 11, kind: output, shape index: {}]  }
   0x1   :  { %17 = vsyncpa [#allocation5], 0 }
   0x2   :  { %18 = vsyncpa [#allocation8], 0  ;;  %s940_s17 = smov [#allocation4]   ;;  %s846_s21 = scalar_lea.hbm %s1188_s1, 256 }
   0x3   :  { %s36_s18 = sshll.u32 %s940_s17, 4  ;;  %p847_p0 = scmp.ne.s32.totalorder %s1188_s1, %s846_s21  ;;  %s37_s18 = int_to_ptr.vmem [resolvable:$true] %s36_s18 }
   0x4   :  { %p850_p1 = scmp.lt.u32.totalorder %s846_s21, %s1188_s1 }
   0x6   :  { %p852_p2 = pnand %p850_p1, %p847_p0 }
   0x8   :  { %855 = shalt.err (!%p852_p2)
}
   0x9   :  { %s856_s26 = scalar_lea.vmem %s37_s18, 256  ;;  %p861_p4 = scmp.lt.s32.totalorder %s37_s18, %s37_s18 }
   0xa   :  { %p857_p3 = scmp.ne.s32.totalorder %s37_s18, %s856_s26  ;;  %p862_p5 = scmp.lt.s32.totalorder %s856_s26, %s856_s26 }
   0xc   :  { %p863_p6 = por %p862_p5, %p861_p4 }
   0xe   :  { %p864_p7 = pnand %p863_p6, %p857_p3 }
  0x10   :  { %867 = shalt.err (!%p864_p7)
}
  0x11   :  { %s941_s27 = smov 64   ;;  %s942_s28 = smov 4  }
  0x12   :  { %42 = dma.hbm_to_vmem [thread:$0]  %s1188_s1, 256, %s37_s18, [#allocation5], %s941_s27, %s941_s27, %s942_s28  }
  0x13   :  { %s943_s12 = smov [#allocation2]   ;;  %s868_s16 = scalar_lea.hbm %s1187_s0, 256 }
  0x14   :  { %s24_s13 = sshll.u32 %s943_s12, 4  ;;  %p869_p8 = scmp.ne.s32.totalorder %s1187_s0, %s868_s16  ;;  %s25_s13 = int_to_ptr.vmem [resolvable:$true] %s24_s13 }
  0x15   :  { %p872_p9 = scmp.lt.u32.totalorder %s868_s16, %s1187_s0 }
  0x17   :  { %p874_p10 = pnand %p872_p9, %p869_p8 }
  0x19   :  { %877 = shalt.err (!%p874_p10)
}
  0x1a   :  { %s878_s22 = scalar_lea.vmem %s25_s13, 256  ;;  %p883_p12 = scmp.lt.s32.totalorder %s25_s13, %s25_s13 }
  0x1b   :  { %p879_p11 = scmp.ne.s32.totalorder %s25_s13, %s878_s22  ;;  %p884_p13 = scmp.lt.s32.totalorder %s878_s22, %s878_s22 }
  0x1d   :  { %p885_p0 = por %p884_p13, %p883_p12 }
  0x1f   :  { %p886_p1 = pnand %p885_p0, %p879_p11 }
  0x21   :  { %889 = shalt.err (!%p886_p1)
}
  0x22   :  { %s944_s1 = smov 128   ;;  %s945_s18 = smov 8  }
  0x23   :  { %30 = dma.hbm_to_vmem [thread:$0]  %s1187_s0, 256, %s25_s13, [#allocation3], %s944_s1, %s944_s1, %s945_s18  }
  0x24   :  { %s946_s25 = smov [#allocation6]   ;;  %s947_s29 = smov [#allocation7]  }
  0x25   :  { %s54_s26 = sshll.u32 %s946_s25, 4  ;;  %s68_s30 = sshll.u32 %s947_s29, 4  ;;  %s55_s26 = int_to_ptr.vmem [resolvable:$true] %s54_s26  ;;  %s1037_s30 = int_to_ptr.vmem [resolvable:$true] %s68_s30 }
  0x26   :  { %s890_s15 = scalar_lea.hbm %s1192_s5, 1024 }
  0x27   :  { %p891_p2 = scmp.ne.s32.totalorder %s1192_s5, %s890_s15  ;;  %p894_p3 = scmp.lt.u32.totalorder %s890_s15, %s1192_s5 }
  0x29   :  { %p896_p4 = pnand %p894_p3, %p891_p2 }
  0x2b   :  { %899 = shalt.err (!%p896_p4)
}
  0x2c   :  { %s900_s0 = scalar_lea.vmem %s55_s26, 1024  ;;  %p905_p6 = scmp.lt.s32.totalorder %s55_s26, %s55_s26 }
  0x2d   :  { %p901_p5 = scmp.ne.s32.totalorder %s55_s26, %s900_s0  ;;  %p906_p7 = scmp.lt.s32.totalorder %s900_s0, %s900_s0 }
  0x2f   :  { %p907_p8 = por %p906_p7, %p905_p6 }
  0x31   :  { %p908_p9 = pnand %p907_p8, %p901_p5 }
  0x33   :  { %911 = shalt.err (!%p908_p9)
}
  0x34   :  { %60 = dma.hbm_to_vmem [thread:$0]  %s1192_s5, 1024, %s55_s26, [#allocation5], %s941_s27, %s941_s27, %s942_s28  }
  0x35   :  { %s912_s18 = scalar_lea.hbm %s1194_s7, 1024 }
  0x36   :  { %p913_p10 = scmp.ne.s32.totalorder %s1194_s7, %s912_s18  ;;  %p916_p11 = scmp.lt.u32.totalorder %s912_s18, %s1194_s7 }
  0x38   :  { %p918_p12 = pnand %p916_p11, %p913_p10 }
  0x3a   :  { %921 = shalt.err (!%p918_p12)
}
  0x3b   :  { %s922_s12 = scalar_lea.vmem %s1037_s30, 1024  ;;  %p927_p0 = scmp.lt.s32.totalorder %s1037_s30, %s1037_s30 }
  0x3c   :  { %p923_p13 = scmp.ne.s32.totalorder %s1037_s30, %s922_s12  ;;  %p928_p1 = scmp.lt.s32.totalorder %s922_s12, %s922_s12 }
  0x3e   :  { %p929_p2 = por %p928_p1, %p927_p0 }
  0x40   :  { %p930_p3 = pnand %p929_p2, %p923_p13 }
  0x42   :  { %933 = shalt.err (!%p930_p3)
}
  0x43   :  { %74 = dma.hbm_to_vmem [thread:$0]  %s1194_s7, 1024, %s1037_s30, [#allocation8], %s941_s27, %s941_s27, %s942_s28  }
  0x44   :  { %934 = dma.done.wait [#allocation3], 256  }
  0x45   :  { %935 = vsyncadd [#allocation3], 4294967040 }
  0x46   :  { %936 = dma.done.wait [#allocation5], 1280  }
  0x47   :  { %937 = vsyncadd [#allocation5], 4294966016 }
  0x48   :  { %938 = dma.done.wait [#allocation8], 1024  }
  0x49   :  { %939 = vsyncadd [#allocation8], 4294966272  ;;  %v948_v0 = vmov 0.0   ;;  %vm949_vm0 = vmmov 0   ;;  %v812_v1 = vld [vmem:[#allocation4] sm:$0xff]   ;;  %v813_v2 = vld [vmem:[#allocation4 + $0x8] sm:$0xff]  }
  0x4a   :  { %714 = vmatprep.subr.bf16.mxu0 %v948_v0  ;;  %718 = vmatprep.mubr.msk.bf16.mxu0 %vm949_vm0, %v948_v0  ;;  %v94_v3 = vld [vmem:[#allocation2] sm:$0xff]  ;;  %v95_v4 = vld [vmem:[#allocation2 + $0x8] sm:$0xff]  ;;  %vm120_vm1 = vcmask 261120   ;;  %v816_v8 = vld [vmem:[%s1190_s3 + $0x10] sm:$0xff]   ;;  %vm625_vm2 = vcmask 64512  }
  0x4b   :  { %722 = vmatprep.subr.bf16.mxu1 %v948_v0  ;;  %738 = vmatprep.mubr.msk.bf16.mxu1 %vm949_vm0, %v948_v0  ;;  %v814_v5 = vld [vmem:[%s1190_s3] sm:$0xff]   ;;  %v96_v6 = vpack.c.bf16 %v95_v4, %v94_v3  ;;  %v815_v7 = vld [vmem:[%s1190_s3 + $0x8] sm:$0xff]   ;;  %v817_v9 = vld [vmem:[%s1190_s3 + $0x18] sm:$0xff]  }
  0x4c   :  { %715 = vmatpush3.bf16.msra.mxu0 %v812_v1  ;;  %723 = vmatpush3.bf16.msra.mxu1 %v814_v5  ;;  %v818_v10 = vld [vmem:[%s1190_s3 + $0x20] sm:$0xff]   ;;  %v819_v11 = vld [vmem:[%s1190_s3 + $0x28] sm:$0xff]   ;;  %v820_v12 = vld [vmem:[%s1190_s3 + $0x30] sm:$0xff]  }
  0x4d   :  { %716 = vmatprep.subr.bf16.mxu0 %v948_v0  ;;  %724 = vmatprep.subr.bf16.mxu1 %v948_v0  ;;  %v821_v13 = vld [vmem:[%s1190_s3 + $0x38] sm:$0xff]   ;;  %v822_v14 = vld [vmem:[#allocation6] sm:$0xff]   ;;  %v823_v15 = vld [vmem:[#allocation6 + $0x8] sm:$0xff]  }
  0x4e   :  { %v824_v16 = vld [vmem:[#allocation6 + $0x10] sm:$0xff]   ;;  %v825_v17 = vld [vmem:[#allocation6 + $0x18] sm:$0xff]   ;;  %v826_v18 = vld [vmem:[#allocation6 + $0x20] sm:$0xff]  }
  0x4f   :  { %v827_v19 = vld [vmem:[#allocation6 + $0x28] sm:$0xff]   ;;  %v635_v20 = vld [vmem:[%s1189_s2] ss:$0 sm:$0xff]  ;;  %v828_v30 = vld [vmem:[#allocation6 + $0x30] sm:$0xff]  }
  0x50   :  { %717 = vmatpush3.bf16.msra.mxu0 %v813_v2  ;;  %725 = vmatpush3.bf16.msra.mxu1 %v815_v7  ;;  %v829_v31 = vld [vmem:[#allocation6 + $0x38] sm:$0xff]   ;;  %v830_v32 = vld [vmem:[#allocation7] sm:$0xff]   ;;  %v831_v33 = vld [vmem:[#allocation7 + $0x8] sm:$0xff]  }
  0x51   :  { %742 = vmatprep.subr.bf16.mxu0 %v948_v0  ;;  %726 = vmatprep.subr.bf16.mxu1 %v948_v0  ;;  %v832_v34 = vld [vmem:[#allocation7 + $0x10] sm:$0xff]   ;;  %v833_v35 = vld [vmem:[#allocation7 + $0x18] sm:$0xff]   ;;  %v834_v36 = vld [vmem:[#allocation7 + $0x20] sm:$0xff]  }
  0x52   :  { %v835_v37 = vld [vmem:[#allocation7 + $0x28] sm:$0xff]   ;;  %v639_v38 = vld [vmem:[%s1191_s4] ss:$0 sm:$0xff]  ;;  %v836_v48 = vld [vmem:[#allocation7 + $0x30] sm:$0xff]  }
  0x53   :  { %719 = vmatmul.mubr.msk.bf16.vlgmr.msra.gmra.mrb[0].mxu0 %vm120_vm1, %v96_v6  ;;  %v837_v49 = vld [vmem:[#allocation7 + $0x38] sm:$0xff]   ;;  %v838_v50 = vld [vmem:[%s1196_s9] sm:$0xff]   ;;  %v839_v51 = vld [vmem:[%s1196_s9 + $0x8] sm:$0xff]  }
  0x54   :  { %758 = vmatprep.mubr.msk.bf16.mxu0 %vm949_vm0, %v948_v0  ;;  %727 = vmatpush3.bf16.msra.mxu1 %v816_v8  ;;  %v840_v52 = vld [vmem:[%s1196_s9 + $0x10] sm:$0xff]   ;;  %v841_v53 = vld [vmem:[%s1196_s9 + $0x18] sm:$0xff]   ;;  %v842_v54 = vld [vmem:[%s1196_s9 + $0x20] sm:$0xff]  }
  0x55   :  { %728 = vmatprep.subr.bf16.mxu1 %v948_v0  ;;  %743 = vmatpush3.bf16.msra.mxu0 %v822_v14  ;;  %v843_v55 = vld [vmem:[%s1196_s9 + $0x28] sm:$0xff]   ;;  %v648_v56 = vld [vmem:[%s1193_s6] ss:$0 sm:$0xff]  ;;  %v844_v3 = vld [vmem:[%s1196_s9 + $0x30] sm:$0xff]  }
  0x56   :  { %744 = vmatprep.subr.bf16.mxu0 %v948_v0  ;;  %v845_v4 = vld [vmem:[%s1196_s9 + $0x38] sm:$0xff]   ;;  %v657_v5 = vld [vmem:[%s1195_s8] ss:$0 sm:$0xff] }
  0x58   :  { %729 = vmatpush3.bf16.msra.mxu1 %v817_v9 }
  0x59   :  { %730 = vmatprep.subr.bf16.mxu1 %v948_v0  ;;  %745 = vmatpush3.bf16.msra.mxu0 %v823_v15 }
  0x5a   :  { %746 = vmatprep.subr.bf16.mxu0 %v948_v0 }
  0x5c   :  { %731 = vmatpush3.bf16.msra.mxu1 %v818_v10 }
  0x5d   :  { %732 = vmatprep.subr.bf16.mxu1 %v948_v0  ;;  %747 = vmatpush3.bf16.msra.mxu0 %v824_v16 }
  0x5e   :  { %748 = vmatprep.subr.bf16.mxu0 %v948_v0 }
  0x60   :  { %733 = vmatpush3.bf16.msra.mxu1 %v819_v11 }
  0x61   :  { %734 = vmatprep.subr.bf16.mxu1 %v948_v0  ;;  %749 = vmatpush3.bf16.msra.mxu0 %v825_v17 }
  0x62   :  { %750 = vmatprep.subr.bf16.mxu0 %v948_v0 }
  0x64   :  { %735 = vmatpush3.bf16.msra.mxu1 %v820_v12 }
  0x65   :  { %736 = vmatprep.subr.bf16.mxu1 %v948_v0  ;;  %751 = vmatpush3.bf16.msra.mxu0 %v826_v18 }
  0x66   :  { %752 = vmatprep.subr.bf16.mxu0 %v948_v0 }
  0x68   :  { %737 = vmatpush3.bf16.msra.mxu1 %v821_v13 }
  0x69   :  { %762 = vmatprep.subr.bf16.mxu1 %v948_v0  ;;  %753 = vmatpush3.bf16.msra.mxu0 %v827_v19 }
  0x6a   :  { %754 = vmatprep.subr.bf16.mxu0 %v948_v0 }
  0x6d   :  { %755 = vmatpush3.bf16.msra.mxu0 %v828_v30 }
  0x6e   :  { %756 = vmatprep.subr.bf16.mxu0 %v948_v0 }
  0x71   :  { %757 = vmatpush3.bf16.msra.mxu0 %v829_v31 }
  0x72   :  { %782 = vmatprep.subr.bf16.mxu0 %v948_v0 }
 0x126   :  { %v158_v21 = vpop.f32.mrb[0].mxu0 }
 0x127   :  { %v159_v22 = vadd.f32 %v635_v20, %v158_v21  ;;  %v720_v23 = vpop.f32.mrb[1].mxu0 }
 0x128   :  { %v161_v24 = vpop.f32.mrb[2].mxu0 }
 0x129   :  { %v162_v25 = vadd.f32 %v635_v20, %v161_v24  ;;  %v721_v26 = vpop.f32.mrb[3].mxu0  ;;  %v165_v27 = vmax.f32 %v159_v22, 0.0 }
 0x12b   :  { %v166_v28 = vmax.f32 %v162_v25, 0.0 }
 0x12d   :  { %v167_v29 = vpack.c.bf16 %v166_v28, %v165_v27 }
 0x12f   :  { %739 = vmatmul.mubr.bf16.vlgmr.msra.gmra.mrb[0].mxu1 %v167_v29 }
 0x130   :  { %778 = vmatprep.mubr.msk.bf16.mxu1 %vm949_vm0, %v948_v0  ;;  %763 = vmatpush3.bf16.msra.mxu1 %v830_v32 }
 0x131   :  { %764 = vmatprep.subr.bf16.mxu1 %v948_v0 }
 0x134   :  { %765 = vmatpush3.bf16.msra.mxu1 %v831_v33 }
 0x135   :  { %766 = vmatprep.subr.bf16.mxu1 %v948_v0 }
 0x138   :  { %767 = vmatpush3.bf16.msra.mxu1 %v832_v34 }
 0x139   :  { %768 = vmatprep.subr.bf16.mxu1 %v948_v0 }
 0x13c   :  { %769 = vmatpush3.bf16.msra.mxu1 %v833_v35 }
 0x13d   :  { %770 = vmatprep.subr.bf16.mxu1 %v948_v0 }
 0x140   :  { %771 = vmatpush3.bf16.msra.mxu1 %v834_v36 }
 0x141   :  { %772 = vmatprep.subr.bf16.mxu1 %v948_v0 }
 0x144   :  { %773 = vmatpush3.bf16.msra.mxu1 %v835_v37 }
 0x145   :  { %774 = vmatprep.subr.bf16.mxu1 %v948_v0 }
 0x148   :  { %775 = vmatpush3.bf16.msra.mxu1 %v836_v48 }
 0x149   :  { %776 = vmatprep.subr.bf16.mxu1 %v948_v0 }
 0x14c   :  { %777 = vmatpush3.bf16.msra.mxu1 %v837_v49 }
 0x202   :  { %v273_v39 = vpop.f32.mrb[0].mxu1 }
 0x203   :  { %v274_v40 = vadd.f32 %v639_v38, %v273_v39  ;;  %v740_v41 = vpop.f32.mrb[1].mxu1 }
 0x204   :  { %v276_v42 = vpop.f32.mrb[2].mxu1 }
 0x205   :  { %v277_v43 = vadd.f32 %v639_v38, %v276_v42  ;;  %v741_v44 = vpop.f32.mrb[3].mxu1  ;;  %v280_v45 = vmax.f32 %v274_v40, 0.0 }
 0x207   :  { %v281_v46 = vmax.f32 %v277_v43, 0.0 }
 0x209   :  { %v282_v47 = vpack.c.bf16 %v281_v46, %v280_v45 }
 0x20b   :  { %759 = vmatmul.mubr.bf16.vlgmr.msra.gmra.mrb[4].mxu0 %v282_v47 }
 0x20c   :  { %798 = vmatprep.mubr.msk.bf16.mxu0 %vm949_vm0, %v948_v0  ;;  %783 = vmatpush3.bf16.msra.mxu0 %v838_v50 }
 0x20d   :  { %784 = vmatprep.subr.bf16.mxu0 %v948_v0 }
 0x210   :  { %785 = vmatpush3.bf16.msra.mxu0 %v839_v51 }
 0x211   :  { %786 = vmatprep.subr.bf16.mxu0 %v948_v0 }
 0x214   :  { %787 = vmatpush3.bf16.msra.mxu0 %v840_v52 }
 0x215   :  { %788 = vmatprep.subr.bf16.mxu0 %v948_v0 }
 0x218   :  { %789 = vmatpush3.bf16.msra.mxu0 %v841_v53 }
 0x219   :  { %790 = vmatprep.subr.bf16.mxu0 %v948_v0 }
 0x21c   :  { %791 = vmatpush3.bf16.msra.mxu0 %v842_v54 }
 0x21d   :  { %792 = vmatprep.subr.bf16.mxu0 %v948_v0 }
 0x220   :  { %793 = vmatpush3.bf16.msra.mxu0 %v843_v55 }
 0x221   :  { %794 = vmatprep.subr.bf16.mxu0 %v948_v0 }
 0x224   :  { %795 = vmatpush3.bf16.msra.mxu0 %v844_v3 }
 0x225   :  { %796 = vmatprep.subr.bf16.mxu0 %v948_v0  ;;  %v666_v0 = vld [vmem:[%s1197_s10] ss:$0 sm:$0xff] }
 0x228   :  { %797 = vmatpush3.bf16.msra.mxu0 %v845_v4 }
 0x2de   :  { %v388_v57 = vpop.f32.mrb[4].mxu0 }
 0x2df   :  { %v389_v58 = vadd.f32 %v648_v56, %v388_v57  ;;  %v760_v59 = vpop.f32.mrb[5].mxu0 }
 0x2e0   :  { %v391_v60 = vpop.f32.mrb[6].mxu0 }
 0x2e1   :  { %v392_v61 = vadd.f32 %v648_v56, %v391_v60  ;;  %v761_v62 = vpop.f32.mrb[7].mxu0  ;;  %v395_v63 = vmax.f32 %v389_v58, 0.0 }
 0x2e3   :  { %v396_v1 = vmax.f32 %v392_v61, 0.0 }
 0x2e5   :  { %v397_v2 = vpack.c.bf16 %v396_v1, %v395_v63 }
 0x2e7   :  { %779 = vmatmul.mubr.bf16.vlgmr.msra.gmra.mrb[4].mxu1 %v397_v2 }
 0x3ba   :  { %v503_v6 = vpop.f32.mrb[4].mxu1 }
 0x3bb   :  { %v504_v7 = vadd.f32 %v657_v5, %v503_v6  ;;  %v780_v8 = vpop.f32.mrb[5].mxu1 }
 0x3bc   :  { %v506_v9 = vpop.f32.mrb[6].mxu1 }
 0x3bd   :  { %v507_v10 = vadd.f32 %v657_v5, %v506_v9  ;;  %v781_v11 = vpop.f32.mrb[7].mxu1  ;;  %v510_v12 = vmax.f32 %v504_v7, 0.0 }
 0x3bf   :  { %v511_v13 = vmax.f32 %v507_v10, 0.0 }
 0x3c1   :  { %v512_v14 = vpack.c.bf16 %v511_v13, %v510_v12 }
 0x3c3   :  { %799 = vmatmul.mubr.bf16.vlgmr.msra.gmra.mrb[8].mxu0 %v512_v14 }
 0x496   :  { %v618_v15 = vpop.f32.mrb[8].mxu0 }
 0x497   :  { %v619_v16 = vadd.f32 %v666_v0, %v618_v15  ;;  %v800_v17 = vpop.f32.mrb[9].mxu0 }
 0x498   :  { %v621_v18 = vpop.f32.mrb[10].mxu0 }
 0x499   :  { %626 = vst.msk [vmem:[%s1198_s11] sm:$0xff] %vm625_vm2, %v619_v16  ;;  %v622_v19 = vadd.f32 %v666_v0, %v621_v18  ;;  %v801_v20 = vpop.f32.mrb[11].mxu0 }
 0x49b   :  { %627 = vst.msk [vmem:[%s1198_s11 + $0x8] sm:$0xff] %vm625_vm2, %v622_v19 }
 0x49c   :  { %632 = vsyncpa [#allocation3], 1 }
 0x49d   :  { %633 = vsyncpa [#allocation5], 1 }
 0x49e   :  { %634 = vsyncpa [#allocation8], 1 }

</bundles_post_ra>
